<compile_context>
chip_gen: v7x
topology: tpu7x:2x2x1
jax: 0.10.0
libtpu: 0.0.40
codegen_flags: <defaults>
</compile_context>

<pallas_src>
import functools

import jax
import jax.numpy as jnp
from jax.experimental import pallas as pl
from jax.experimental.pallas import tpu as pltpu


# ------------------------------ fused kernel ------------------------------- #

def _cova_kernel(supp_ref, q_ref, out_ref, cov_ref, *, cov_scale):
    """One grid step == (support class j, query-column tile n).

    supp_ref : (C, Bs*HW)  support set of class j, channel-major (j squeezed)
    q_ref    : (C, TN)     L2-normalised query columns, tile n of B*HW
    out_ref  : (1, TN)     diag(q^T cov_j q) for the columns of this tile
    cov_ref  : (C, C) f32  VMEM scratch: class covariance, computed at n == 0
                           and reused across all query tiles of this class.
    """
    @pl.when(pl.program_id(1) == 0)
    def _():
        s = supp_ref[...]                                     # (C, Bs*HW) f32
        xc = s - jnp.mean(s, axis=1, keepdims=True)           # centre channels
        cov = jax.lax.dot_general(                            # Xc @ Xc^T, K = Bs*HW
            xc, xc, (((1,), (1,)), ((), ())),
            preferred_element_type=jnp.float32)
        cov_ref[...] = cov * jnp.float32(cov_scale)

    q = q_ref[...]                                            # (C, TN) f32
    mq = jnp.dot(cov_ref[...], q, preferred_element_type=jnp.float32)  # (C, TN)
    # per-column diag(q^T cov q): elementwise product + sublane reduction.
    out_ref[...] = jnp.sum(q * mq, axis=0, keepdims=True).astype(out_ref.dtype)


# -------------------------------- wrapper ----------------------------------- #

def cova_block(x1, x2_list, *, tn_max=2048):
    """x1: query batch (B, C, H, W).  x2_list: list of support sets, each
       (Bs, C, H, W).  Returns (B, 1, len(x2_list) * H * W), laid out exactly
       like the torch module (j-major concatenation per query)."""
    x2 = jnp.stack(x2_list, axis=0)                       # (J, Bs, C, h, w)
    J, Bs, C, h, w = x2.shape
    HW = h * w
    B, Cq, hq, wq = x1.shape
    assert (Cq, hq, wq) == (C, h, w)
    BHW = B * HW
    BsHW = Bs * HW

    # ---- one-time XLA-side layout & normalisation (amortised over J) -------
    # support: (J, C, Bs*HW) so the in-kernel covariance is a single 2-D matmul
    supp = jnp.transpose(x2, (0, 2, 1, 3, 4)).reshape(J, C, BsHW)
    supp = supp.astype(jnp.float32)
    # queries: exact torch normalisation (NaN on an all-zero channel, like
    # torch), then (C, B*HW) so similarity is one long-N matmul per class.
    q = x1.reshape(B, C, HW).astype(jnp.float32)
    q = q / jnp.linalg.norm(q, axis=2, keepdims=True)
    q2 = jnp.transpose(q, (1, 0, 2)).reshape(C, BHW)

    # query-column tile: full extent if small, else a 128-multiple tile so the
    # last dim of every block stays lane-aligned (partial last tile is masked).
    TN = BHW if BHW <= tn_max else tn_max
    n_tiles = pl.cdiv(BHW, TN)

    n_elems = BsHW
    # torch divides by (Bs*h*w - 1); multiplying by +inf reproduces torch's
    # divide-by-zero behaviour exactly in the degenerate n_elems == 1 case.
    cov_scale = 1.0 / (n_elems - 1) if n_elems > 1 else float("inf")

    cost = pl.CostEstimate(
        flops=int(2 * J * C * C * (BsHW + BHW)),
        transcendentals=0,
        bytes_accessed=int(4 * (supp.size + J * q2.size + J * BHW)),
    )

    sim = pl.pallas_call(
        functools.partial(_cova_kernel, cov_scale=cov_scale),
        out_shape=jax.ShapeDtypeStruct((J, 1, BHW), jnp.float32),
        grid=(J, n_tiles),
        in_specs=[
            # per-class support slab; constant across the inner N axis so it is
            # only re-fetched when j changes.
            pl.BlockSpec((None, C, BsHW), lambda j, n: (j, 0, 0)),
            # query-column tile (lane-dense, changes every step -> default
            # double-buffering does the prefetch; pl.Buffered(1) only applied
            # when the block was constant, which it no longer is).
            pl.BlockSpec((C, TN), lambda j, n: (0, n)),
        ],
        out_specs=pl.BlockSpec((None, 1, TN), lambda j, n: (j, 0, n)),
        scratch_shapes=[pltpu.VMEM((C, C), jnp.float32)],
        compiler_params=pltpu.CompilerParams(
            # covariance scratch carries across query tiles -> N is arbitrary;
            # classes are independent -> J is parallel (megacore).
            dimension_semantics=("parallel", "arbitrary"),
        ),
        cost_estimate=cost,
    )(supp, q2)                                           # (J, 1, B*HW)

    # torch layout: out[b, 0, j*HW + p]  -> tiny XLA permute of the output.
    sim = sim.reshape(J, B, HW)
    return jnp.transpose(sim, (1, 0, 2)).reshape(B, 1, J * HW)


# ---------------------------- pure-JAX reference ---------------------------- #

def _reference(x1, x2_list):
    covs = []
    for s in x2_list:
        Bs, C, h, w = s.shape
        X = jnp.transpose(s, (1, 0, 2, 3)).reshape(C, -1)
        Xc = X - jnp.mean(X, axis=1, keepdims=True)
        covs.append(Xc @ Xc.T / (h * w * Bs - 1))
    B, C, h, w = x1.shape
    outs = []
    for i in range(B):
        q = x1[i].reshape(C, -1)
        q = q / jnp.linalg.norm(q, axis=1, keepdims=True)
        row = [jnp.diag(q.T @ M @ q) for M in covs]
        outs.append(jnp.concatenate(row)[None, None, :])
    return jnp.concatenate(outs, 0)


# ----------------------------------- main ------------------------------------ #

if __name__ == "__main__":
    key = jax.random.PRNGKey(0)
    B, C, H, W = 2, 8, 4, 4          # query batch
    J, Bs = 3, 2                     # number of support classes, support shots
    k1, *ks = jax.random.split(key, 1 + J)
    x1 = jax.random.normal(k1, (B, C, H, W), dtype=jnp.float32)
    x2_list = [jax.random.normal(k, (Bs, C, H, W), dtype=jnp.float32) for k in ks]

    out = jax.block_until_ready(cova_block(x1, x2_list))
    ref = jax.block_until_ready(_reference(x1, x2_list))

    assert out.shape == (B, 1, J * H * W), out.shape
    assert jnp.allclose(out, ref, atol=1e-4, rtol=1e-4), \
        float(jnp.max(jnp.abs(out - ref)))
    print("KERNEL_OK")
</pallas_src>

<mosaic_0001>
module attributes {stable_mosaic.version = 11 : i64} {
  func.func @_cova_kernel(%arg0: i32, %arg1: i32, %arg2: memref<1x8x32xf32, #tpu.memory_space<vmem>>, %arg3: memref<8x32xf32, #tpu.memory_space<vmem>>, %arg4: memref<1x1x32xf32, #tpu.memory_space<vmem>>, %arg5: memref<8x8xf32, #tpu.memory_space<vmem>>) attributes {dimension_semantics = [#tpu.dimension_semantics<parallel>, #tpu.dimension_semantics<arbitrary>], iteration_bounds = array<i64: 3, 1>, scalar_prefetch = 0 : i64, scratch_operands = 1 : i64, tpu.core_type = #tpu.core_type<tc>, window_params = [{transform_indices = @transform_0, window_bounds = array<i64: 1, 8, 32>}, {transform_indices = @transform_1, window_bounds = array<i64: 8, 32>}, {transform_indices = @transform_2, window_bounds = array<i64: 1, 1, 32>}]} {
    %c0_i32 = arith.constant 0 : i32
    %0 = arith.cmpi eq, %arg1, %c0_i32 : i32
    %1 = arith.extui %0 : i1 to i32
    %c0_i32_0 = arith.constant 0 : i32
    %2 = arith.cmpi ne, %1, %c0_i32_0 : i32
    scf.if %2 {
      %c0_8 = arith.constant 0 : index
      %c0_9 = arith.constant 0 : index
      %c0_10 = arith.constant 0 : index
      %12 = vector.load %arg2[%c0_8, %c0_9, %c0_10] : memref<1x8x32xf32, #tpu.memory_space<vmem>>, vector<1x8x32xf32>
      %13 = vector.shape_cast %12 : vector<1x8x32xf32> to vector<8x32xf32>
      %cst_11 = arith.constant dense<0.000000e+00> : vector<8xf32>
      %14 = vector.multi_reduction <add>, %13, %cst_11 [1] : vector<8x32xf32> to vector<8xf32>
      %15 = vector.shape_cast %14 : vector<8xf32> to vector<8x1xf32>
      %cst_12 = arith.constant 3.200000e+01 : f32
      %16 = vector.broadcast %cst_12 : f32 to vector<8x1xf32>
      %17 = arith.divf %15, %16 : vector<8x1xf32>
      %18 = vector.broadcast %17 : vector<8x1xf32> to vector<8x32xf32>
      %19 = arith.subf %13, %18 : vector<8x32xf32>
      %cst_13 = arith.constant dense<0.000000e+00> : vector<8x8xf32>
      %20 = tpu.matmul %19, %19, %cst_13 {dimension_numbers = #tpu.dot_dimension_numbers<[1], [1], [0], [0], [0, 0, 1, 0], [], []>} : vector<8x32xf32>, vector<8x32xf32>, vector<8x8xf32> -> vector<8x8xf32>
      %cst_14 = arith.constant 0.0322580636 : f32
      %21 = vector.broadcast %cst_14 : f32 to vector<8x8xf32>
      %22 = arith.mulf %20, %21 : vector<8x8xf32>
      %c0_15 = arith.constant 0 : index
      %c0_16 = arith.constant 0 : index
      %23 = vector.load %arg5[%c0_15, %c0_16] : memref<8x8xf32, #tpu.memory_space<vmem>>, vector<8x8xf32>
      tpu.vector_store %arg5[%c0_15, %c0_16], %22 {strides = array<i32>} : memref<8x8xf32, #tpu.memory_space<vmem>>, vector<8x8xf32>,
    } else {
    }
    %c0 = arith.constant 0 : index
    %c0_1 = arith.constant 0 : index
    %3 = vector.load %arg3[%c0, %c0_1] : memref<8x32xf32, #tpu.memory_space<vmem>>, vector<8x32xf32>
    %c0_2 = arith.constant 0 : index
    %c0_3 = arith.constant 0 : index
    %4 = vector.load %arg5[%c0_2, %c0_3] : memref<8x8xf32, #tpu.memory_space<vmem>>, vector<8x8xf32>
    %cst = arith.constant dense<0.000000e+00> : vector<8x32xf32>
    %5 = tpu.matmul %4, %3, %cst {dimension_numbers = #tpu.dot_dimension_numbers<[1], [0], [0], [1], [0, 0, 1, 1], [], []>} : vector<8x8xf32>, vector<8x32xf32>, vector<8x32xf32> -> vector<8x32xf32>
    %6 = arith.mulf %3, %5 : vector<8x32xf32>
    %cst_4 = arith.constant dense<0.000000e+00> : vector<32xf32>
    %7 = vector.multi_reduction <add>, %6, %cst_4 [0] : vector<8x32xf32> to vector<32xf32>
    %8 = vector.shape_cast %7 : vector<32xf32> to vector<1x32xf32>
    %c0_5 = arith.constant 0 : index
    %c0_6 = arith.constant 0 : index
    %c0_7 = arith.constant 0 : index
    %9 = vector.load %arg4[%c0_5, %c0_6, %c0_7] : memref<1x1x32xf32, #tpu.memory_space<vmem>>, vector<1x1x32xf32>
    %10 = vector.shape_cast %9 : vector<1x1x32xf32> to vector<1x32xf32>
    %11 = vector.shape_cast %8 : vector<1x32xf32> to vector<1x1x32xf32>
    tpu.vector_store %arg4[%c0_5, %c0_6, %c0_7], %11 {strides = array<i32>} : memref<1x1x32xf32, #tpu.memory_space<vmem>>, vector<1x1x32xf32>,
    return
  }
  func.func @transform_0(%arg0: i32, %arg1: i32) -> (i32, i32, i32) {
    %c0_i32 = arith.constant 0 : i32
    %c0_i32_0 = arith.constant 0 : i32
    %c0_i32_1 = arith.constant 0 : i32
    return %arg0, %c0_i32, %c0_i32_0 : i32, i32, i32
  }
  func.func @transform_1(%arg0: i32, %arg1: i32) -> (i32, i32) {
    %c0_i32 = arith.constant 0 : i32
    %c0_i32_0 = arith.constant 0 : i32
    return %c0_i32, %arg1 : i32, i32
  }
  func.func @transform_2(%arg0: i32, %arg1: i32) -> (i32, i32, i32) {
    %c0_i32 = arith.constant 0 : i32
    %c0_i32_0 = arith.constant 0 : i32
    return %arg0, %c0_i32, %arg1 : i32, i32, i32
  }
}

</mosaic_0001>

<bundles_post_ra>
// kernel: tpu_custom_call.1
= control target key start
LH: loop header
LB: loop body
LE: loop exit
PB: predicated region body
PF: predicated region fallthrough
CT: control target
= control target key end

     0   :  { %7 = vsyncpa [#allocation4], 0  ;;  %s958_s0 = inlined_call_operand.hbm [shape: f32[3,8,32], index: 0, kind: input, shape index: {}]   ;;  %s959_s1 = inlined_call_operand.hbm [shape: f32[8,32], index: 1, kind: input, shape index: {}]   ;;  %s960_s2 = inlined_call_operand.hbm [shape: f32[3,1,32], index: 2, kind: output, shape index: {}]  }
   0x1   :  { %9 = vsyncpa [#allocation4 + $0x1], 0 }
   0x2   :  { %10 = vsyncpa [#allocation7], 0 }
   0x3   :  { %11 = vsyncpa [#allocation5], 0 }
   0x4   :  { %13 = vsyncpa [#allocation5 + $0x1], 0  ;;  %s739_s9 = smov 0   ;;  %s741_s10 = smov 0  }
   0x5   :  { %s743_s11 = smov 0   ;;  %s745_s12 = smov 0  }
   0x6   :  { %s747_s13 = smov 0   ;;  %s749_s14 = smov 0  }
   0x7 LB: > { %s468_s15 = sadd.s32 4294967295, %s717_s14   ;;  %s469_s16 = sadd.s32 4294967294, %s717_s14   ;;  %s717_s14 = sphi %s749_s14, %s19_s14   ;;  %s713_s13 = sphi %s747_s13, %s984_s13   ;;  %s709_s12 = sphi %s745_s12, %s983_s12   ;;  %s705_s11 = sphi %s743_s11, %s982_s11   ;;  %s701_s10 = sphi %s741_s10, %s981_s10   ;;  %s697_s9 = sphi %s739_s9, %s980_s9  }
   0x8   : > { %p51_p0 = scmp.ne.s32.totalorder %s701_s10, %s697_s9  ;;  %p773_p1 = scmp.eq.s32.totalorder %s468_s15, 0 }
   0x9   : > { %p777_p2 = scmp.eq.s32.totalorder %s468_s15, 2  ;;  %p109_p3 = scmp.eq.s32.totalorder %s469_s16, 2 }
   0xa   : > { %s965_s17 = scalar_select %p773_p1, 1, 0 }
   0xb   : > { %s966_s18 = scalar_select %p777_p2, 1, 0 }
   0xc   : > { %p783_p4 = por %p773_p1, %p51_p0  ;;  %p470_p5 = scmp.ge.s32.totalorder %s717_s14, 1 }
   0xd   : > { %p788_p6 = por %p109_p3, %p51_p0  ;;  %p116_p7 = scmp.lt.s32.totalorder %s717_s14, 4 }
   0xe   : > { %s967_s19 = scalar_select %p783_p4, 1, 0 }
   0xf   : > { %s968_s20 = scalar_select %p788_p6, 1, 0 }
  0x10   : > { %p793_p8 = pnand %p470_p5, %p116_p7  ;;  %s719_s22 = smov [#allocation6]  }
  0x11   : > { %s131_s23 = sshll.u32 %s719_s22, 4  ;;  %s31_s25 = sadd.s32 1, %s713_s13  ;;  %s132_s23 = int_to_ptr.vmem [resolvable:$true] %s131_s23 }
  0x12   : > { %s969_s21 = scalar_select %p793_p8, 1, 0 }
  0x13   : > { %p506_p9 = pneg %p793_p8  ;;  %s38_s26 = sadd.s32 1, %s705_s11 }
  0x14   : > { %p807_p11 = scmp.ge.s32.totalorder %s31_s25, 3  ;;  %s573_s30 = scalar_lea.hbm %s959_s1, 128 }
  0x15   : > { %p801_p10 = pnand %p506_p9, %p773_p1  ;;  %p574_p12 = scmp.ne.s32.totalorder %s959_s1, %s573_s30 }
  0x16   : > { %s971_s27 = scalar_select %p807_p11, 1, 0 }
  0x17   : > { %p575_p13 = pneg %p801_p10  ;;  %p580_p5 = scmp.lt.u32.totalorder %s573_s30, %s959_s1 }
  0x19   : > { %p576_p0 = pnand %p575_p13, %p574_p12 }
  0x1b   : > { %p577_p3 = pneg %p576_p0 }
  0x1d   : > { %p582_p7 = pnand %p580_p5, %p577_p3 }
  0x1f   : > { %585 = shalt.err (!%p582_p7)
}
  0x20   : > { %s586_s7 = scalar_lea.vmem %s132_s23, 128  ;;  %p594_p4 = scmp.lt.s32.totalorder %s132_s23, %s132_s23 }
  0x21   : > { %p587_p9 = scmp.ne.s32.totalorder %s132_s23, %s586_s7  ;;  %p595_p8 = scmp.lt.s32.totalorder %s586_s7, %s586_s7 }
  0x23   : > { %p589_p6 = pnand %p587_p9, %p575_p13  ;;  %p596_p2 = por %p595_p8, %p594_p4 }
  0x25   : > { %p590_p1 = pneg %p589_p6 }
  0x27   : > { %p597_p11 = pnand %p596_p2, %p590_p1 }
  0x29   : > { %600 = shalt.err (!%p597_p11)
}
  0x2a   : > { %509 = dma.hbm_to_vmem [thread:$0]  (!%p801_p10), %s959_s1, 128, %s132_s23, [#allocation7]  }
  0x2b   : > { %p972_p4 = scmp.ne.s32.totalorder %s971_s27, 0  ;;  %p45_p1 = scmp.ne.s32.totalorder %s705_s11, %s701_s10 }
  0x2c   : > { %p46_p2 = scmp.eq.s32.totalorder %s717_s14, 0  ;;  %p519_p6 = scmp.lt.s32.totalorder %s717_s14, 3 }
  0x2d   : > { %s986_s25 = smov (%p972_p4, %s31_s25), 0  ;;  %p973_p12 = scmp.ne.s32.totalorder %s966_s18, 0 }
  0x2e   : > { %s35_s16 = ssub.s32 %s713_s13, %s986_s25  ;;  %p47_p11 = por %p46_p2, %p45_p1 }
  0x2f   : > { %p36_p8 = scmp.eq.s32.totalorder %s35_s16, 0  ;;  %p839_p13 = por %p973_p12, %p45_p1 }
  0x30   : > { %s142_s24 = sand.u32 1, %s705_s11   ;;  %s474_s27 = sshll.u32 %s713_s13, 7 }
  0x31   : > { %s847_s28 = scalar_select %p36_p8, %s705_s11, %s38_s26  }
  0x32   : > { %s473_s23 = sshll.u32 %s142_s24, 3  ;;  %s853_s3 = scalar_lea.hbm %s958_s0, %s474_s27 }
  0x33   : > { %s146_s18 = scalar_lea.vmem [#allocation3], %s473_s23  ;;  %p857_p10 = pnand %p519_p6, %p47_p11 }
  0x34   : > { %s153_s4 = sshll.u32 %s146_s18, 4  ;;  %s143_s26 = scalar_lea.sflag [#allocation4], %s142_s24  ;;  %s855_s4 = int_to_ptr.vmem [resolvable:$true] %s153_s4 }
  0x35   : > { %s601_s6 = scalar_lea.hbm %s853_s3, 128  ;;  %p603_p3 = pneg %p857_p10 }
  0x36   : > { %p602_p0 = scmp.ne.s32.totalorder %s853_s3, %s601_s6  ;;  %s606_s15 = scalar_lea.hbm %s958_s0, 384 }
  0x37   : > { %p607_p9 = scmp.lt.u32.totalorder %s853_s3, %s958_s0  ;;  %p608_p4 = scmp.lt.u32.totalorder %s606_s15, %s601_s6 }
  0x38   : > { %p604_p5 = pnand %p603_p3, %p602_p0  ;;  %p610_p2 = scmp.lt.u32.totalorder %s601_s6, %s853_s3 }
  0x39   : > { %p609_p1 = por %p608_p4, %p607_p9 }
  0x3a   : > { %p605_p7 = pneg %p604_p5 }
  0x3b   : > { %p611_p6 = por %p610_p2, %p609_p1 }
  0x3d   : > { %p612_p8 = pnand %p611_p6, %p605_p7 }
  0x3f   : > { %615 = shalt.err (!%p612_p8)
}
  0x40   : > { %s616_s24 = scalar_lea.vmem %s855_s4, 128  ;;  %s720_s27 = smov [#allocation3]  }
  0x41   : > { %p617_p11 = scmp.ne.s32.totalorder %s855_s4, %s616_s24  ;;  %s621_s29 = sshll.u32 %s720_s27, 4  ;;  %s622_s29 = int_to_ptr.vmem [resolvable:$false] %s621_s29 }
  0x42   : > { %s623_s30 = scalar_lea.vmem %s622_s29, 256  ;;  %p624_p5 = scmp.lt.s32.totalorder %s855_s4, %s622_s29 }
  0x43   : > { %p619_p12 = pnand %p617_p11, %p603_p3  ;;  %p625_p9 = scmp.lt.s32.totalorder %s623_s30, %s616_s24 }
  0x45   : > { %p620_p0 = pneg %p619_p12  ;;  %p626_p4 = por %p625_p9, %p624_p5 }
  0x47   : > { %p627_p1 = pnand %p626_p4, %p620_p0 }
  0x49   : > { %630 = shalt.err (!%p627_p1)
}
  0x4a   : > { %513 = dma.hbm_to_vmem [thread:$0]  (!%p857_p10), %s853_s3, 128, %s855_s4, %s143_s26  }
  0x4b   : > { %p976_p7 = scmp.ne.s32.totalorder %s969_s21, 0 }
  0x4c   : > { %s889_s18 = sand.u32 (!%p976_p7), 1, %s701_s10   ;;  %p977_p3 = scmp.ne.s32.totalorder (!%p976_p7), %s967_s19, 0 }
  0x4d   : > { %162 = sbr.rel (%p976_p7) target bundleno = 702 (0x2be), region = 28  ;;  %s476_s6 = sshll.u32 (!%p976_p7), %s889_s18, 3 }
  0x4e   : > { %s165_s7 = scalar_lea.sflag (!%p976_p7), [#allocation4], %s889_s18  ;;  %s168_s8 = scalar_lea.vmem (!%p976_p7), [#allocation3], %s476_s6 }
  0x54   : > { %684 = dma.done.wait (%p977_p3), %s165_s7, 128  }
  0x55   : > { %686 = vsyncadd (%p977_p3), %s165_s7, 4294967168  ;;  %p978_p2 = scmp.ne.s32.totalorder %s965_s17, 0 }
  0x57   : > { %688 = dma.done.wait (%p978_p2), [#allocation7], 128  }
  0x58   : > { %690 = vsyncadd (%p978_p2), [#allocation7], 4294967168  ;;  %vm197_vm0 = vcmask 261120   ;;  %v196_v0 = vld [vmem:[%s168_s8] sm:$0xff]  ;;  %v721_v2 = vmov 0.0   ;;  %vm722_vm1 = vmmov 0  }
  0x59   : > { %v198_v1 = vsel %vm197_vm0, %v196_v0, 0.0  ;;  %488 = vmatprep.subr.mxu0 %v721_v2  ;;  %493 = vmatprep.subr.mxu1 %v721_v2  ;;  %v280_v6 = vld [vmem:[#allocation6] sm:$0xff]  ;;  %vm278_vm2 = vcmask 64512   ;;  %s481_s17 = sshll.u32 %s709_s12, 4  ;;  %s191_s19 = scalar_lea.vmem [#allocation8], %s889_s18  ;;  %vm365_vm3 = vcmask 253952  }
  0x5a   : > { %199 = vadd.xlane.f32.xlu0 %v198_v1  ;;  %490 = vmatprep.mubr.msk.f32.mxu0 %vm722_vm1, %v721_v2  ;;  %s381_s21 = sshll.u32 %s191_s19, 4  ;;  %s910_s5 = scalar_lea.hbm %s960_s2, %s481_s17  ;;  %s912_s21 = int_to_ptr.vmem [resolvable:$true] %s381_s21 }
  0x5b   : > { %495 = vmatprep.mubr.msk.f32.mxu1 %vm722_vm1, %v721_v2  ;;  %494 = vmatpush3.msra.mxu1 %v280_v6  ;;  %s368_s26 = scalar_lea.sflag [#allocation5], %s889_s18  ;;  %s631_s15 = scalar_lea.vmem %s912_s21, 16 }
  0x5c   : > { %p632_p10 = scmp.ne.s32.totalorder %s912_s21, %s631_s15  ;;  %s723_s12 = smov [#allocation8]  }
  0x5d   : > { %s635_s16 = sshll.u32 %s723_s12, 4  ;;  %s636_s16 = int_to_ptr.vmem [resolvable:$false] %s635_s16 }
  0x5e   : > { %p633_p6 = pnand %p632_p10, %p839_p13  ;;  %s637_s23 = scalar_lea.vmem %s636_s16, 32 }
  0x5f   : > { %p638_p11 = scmp.lt.s32.totalorder %s912_s21, %s636_s16  ;;  %p639_p12 = scmp.lt.s32.totalorder %s637_s23, %s631_s15 }
  0x60   : > { %p634_p8 = pneg %p633_p6 }
  0x61   : > { %p640_p0 = por %p639_p12, %p638_p11 }
  0x63   : > { %p641_p5 = pnand %p640_p0, %p634_p8 }
  0xe7   : > { %v200_v3 = vpop.xlane.xlu0 %199 }
  0xe8   : > { %v202_v4 = vmul.f32 0.03125, %v200_v3 }
  0xea   : > { %v203_v5 = vsub.f32 %v196_v0, %v202_v4 }
  0xec   : > { %489 = vmatpush3.xpose.msk.msra.mxu0 %vm197_vm0, %v203_v5 }
  0xef   : > { %491 = vmatmul.mubr.msk.f32.vlgmr.msra.gmra.mrb[0].mxu0 %vm197_vm0, %v203_v5 }
 0x1c2   : > { %v273_v7 = vpop.f32.mrb[0].mxu0 }
 0x1c3   : > { %v277_v8 = vmul.f32 0.032258064, %v273_v7  ;;  %v492_v9 = vpop.f32.mrb[1].mxu0 }
 0x1c5   : > { %279 = vst.msk [vmem:[#allocation2] sm:$0xff] %vm278_vm2, %v277_v8 }
 0x1cc   : > { %v281_v10 = vld [vmem:[#allocation2] sm:$0xff] }
 0x1cd   : > { %496 = vmatmul.mubr.msk.f32.vlgmr.msra.gmra.mrb[0].mxu1 %vm278_vm2, %v281_v10 }
 0x2a0   : > { %v352_v11 = vpop.f32.mrb[0].mxu1 }
 0x2a1   : > { %v356_v12 = vmul.f32 %v352_v11, %v280_v6  ;;  %v497_v13 = vpop.f32.mrb[1].mxu1 }
 0x2a3   : > { %v358_v14 = vsel %vm197_vm0, %v356_v12, 0.0 }
 0x2a4   : > { %v359_v15 = vrot.slane %v358_v14, 4 }
 0x2a6   : > { %v360_v16 = vadd.f32 %v359_v15, %v358_v14 }
 0x2a8   : > { %v361_v17 = vrot.slane %v360_v16, 2 }
 0x2aa   : > { %v362_v18 = vadd.f32 %v361_v17, %v360_v16 }
 0x2ac   : > { %v363_v19 = vrot.slane %v362_v18, 1 }
 0x2ae   : > { %v364_v20 = vadd.f32 %v363_v19, %v362_v18 }
 0x2b0   : > { %366 = vst.msk [vmem:[%s191_s19] sm:$0x1] %vm365_vm3, %v364_v20 }
 0x2b1   : > { %644 = shalt.err (!%p641_p5)
}
 0x2b2   : > { %s645_s24 = scalar_lea.hbm %s910_s5, 16  ;;  %s649_s30 = scalar_lea.hbm %s960_s2, 48 }
 0x2b3   : > { %p646_p9 = scmp.ne.s32.totalorder %s910_s5, %s645_s24  ;;  %p650_p7 = scmp.lt.u32.totalorder %s910_s5, %s960_s2 }
 0x2b4   : > { %p651_p3 = scmp.lt.u32.totalorder %s649_s30, %s645_s24  ;;  %p653_p10 = scmp.lt.u32.totalorder %s645_s24, %s910_s5 }
 0x2b5   : > { %p647_p4 = pnand %p646_p9, %p839_p13 }
 0x2b6   : > { %p652_p2 = por %p651_p3, %p650_p7 }
 0x2b7   : > { %p648_p1 = pneg %p647_p4 }
 0x2b8   : > { %p654_p6 = por %p653_p10, %p652_p2 }
 0x2ba   : > { %p655_p8 = pnand %p654_p6, %p648_p1 }
 0x2bc   : > { %658 = shalt.err (!%p655_p8)
}
 0x2bd   : > { %504 = dma.vmem_to_hbm [thread:$0]  (%p839_p13), %s912_s21, 16, %s910_s5, %s368_s26  }
 0x2be PF: > { %p521_p11 = scmp.ge.s32.totalorder %s717_s14, 2  ;;  %s393_s7 = sand.u32 1, %s697_s9  }
 0x2bf   : > { %p979_p12 = scmp.ne.s32.totalorder %s968_s20, 0  ;;  %s394_s8 = scalar_lea.sflag [#allocation5], %s393_s7 }
 0x2c1   : > { %p515_p0 = pnand %p521_p11, %p979_p12 }
 0x2c3   : > { %692 = dma.done.wait (!%p515_p0), %s394_s8, 16  }
 0x2c4   : > { %694 = vsyncadd (!%p515_p0), %s394_s8, 4294967280  ;;  %s19_s14 = sadd.s32 1, %s717_s14   ;;  %s980_s9 = smov %s701_s10 }
 0x2c5   : > { %p16_p5 = scmp.ge.s32.totalorder %s19_s14, 5   ;;  %s981_s10 = smov %s705_s11 }
 0x2c6   : > { %s982_s11 = smov %s847_s28  ;;  %s983_s12 = smov %s713_s13 }
 0x2c7   : > { %s984_s13 = smov %s986_s25  ;;  %18 = sbr.rel (!%p16_p5) target bundleno = 7 (0x7), region = 82 }
 0x2ce   :  { %398 = vsyncpa [#allocation4], 1 }
 0x2cf   :  { %400 = vsyncpa [#allocation4 + $0x1], 1 }
 0x2d0   :  { %401 = vsyncpa [#allocation7], 1 }
 0x2d1   :  { %402 = vsyncpa [#allocation5], 1 }
 0x2d2   :  { %404 = vsyncpa [#allocation5 + $0x1], 1 }

</bundles_post_ra>
